<compile_context>
chip_gen: v5e
topology: v5e:2x2
jax: 0.10.0
libtpu: 0.0.40
codegen_flags: <defaults>
</compile_context>

<pallas_src>
import jax
import jax.numpy as jnp
from jax.experimental import pallas as pl
from jax.experimental.pallas import tpu as pltpu

_TARGET_CHUNK_BYTES = 8 * 1024 * 1024   # ~8 MiB per DMA chunk
_MAX_CHUNKS = 16


def _resolve_shape(numel, shape):
    """Resolve a single -1 the way torch.view does."""
    shape = list(shape)
    if -1 in shape:
        i = shape.index(-1)
        known = 1
        for j, s in enumerate(shape):
            if j != i:
                known *= s
        assert known != 0 and numel % known == 0, \
            "view: shape incompatible with input numel"
        shape[i] = numel // known
    prod = 1
    for s in shape:
        prod *= s
    assert prod == numel, "view: shape incompatible with input numel"
    return tuple(shape)


def _pick_nchunks(numel, itemsize):
    """Largest power-of-two <= min(_MAX_CHUNKS, ideal) that divides numel.

    Ideal = total_bytes / 8 MiB (clamped to >= 2 so v7x's two TensorCores both
    get work); odd / indivisible sizes fall back to a single whole-array DMA.
    """
    if numel == 0:
        return 1
    total_bytes = numel * itemsize
    want = max(2, min(_MAX_CHUNKS, total_bytes // _TARGET_CHUNK_BYTES))
    n = 1
    p = 2
    while p <= want and numel % p == 0:
        n = p
        p *= 2
    return n


def _dma_copy_kernel(x_hbm, o_hbm, sem):
    # One big HBM -> HBM row DMA per grid step; no VMEM staging at all.
    i = pl.program_id(0)
    cp = pltpu.make_async_copy(x_hbm.at[i], o_hbm.at[i], sem)
    cp.start()
    cp.wait()


def _materialized_copy(x_flat):
    """Fresh HBM buffer with the same contents, copied by the DMA engine."""
    numel = x_flat.size
    itemsize = x_flat.dtype.itemsize
    nchunks = _pick_nchunks(numel, itemsize)
    chunk = numel // nchunks

    x2d = x_flat.reshape(nchunks, chunk)    # metadata-only reframe

    out2d = pl.pallas_call(
        _dma_copy_kernel,
        out_shape=jax.ShapeDtypeStruct((nchunks, chunk), x_flat.dtype),
        grid=(nchunks,),
        in_specs=[pl.BlockSpec(memory_space=pl.ANY)],
        out_specs=pl.BlockSpec(memory_space=pl.ANY),
        scratch_shapes=[pltpu.SemaphoreType.DMA(())],
        compiler_params=pltpu.CompilerParams(
            dimension_semantics=("parallel",)),
        cost_estimate=pl.CostEstimate(
            flops=0,
            transcendentals=0,
            bytes_accessed=2 * numel * itemsize),
    )(x2d)

    return out2d.reshape(numel)


def view_pallas(x, shape, materialize=False):
    """Equivalent of nn.Module View(shape).forward(x) for contiguous x.

    Default: metadata-only reshape (exact torch .view semantics, zero traffic).
    materialize=True: additionally produce a freshly materialized copy via a
    Pallas HBM->HBM DMA kernel.
    """
    numel = x.size
    out_shape = _resolve_shape(numel, shape)
    if not materialize or numel == 0:
        return jnp.reshape(x, out_shape)
    flat = jnp.reshape(x, (numel,))         # metadata-only flatten
    return _materialized_copy(flat).reshape(out_shape)


if __name__ == "__main__":
    key = jax.random.PRNGKey(0)

    # DCGAN-style usage: flatten conv features, View((-1, C*H*W))
    x = jax.random.normal(key, (2, 4, 16, 16), dtype=jnp.float32)
    y_ref = x.reshape(2, 4 * 16 * 16)

    # Default path: zero-copy reshape (matches torch .view on contiguous mem).
    y0 = view_pallas(x, (-1, 4 * 16 * 16))
    jax.block_until_ready(y0)
    assert y0.shape == (2, 1024) and y0.dtype == x.dtype
    assert bool(jnp.all(y0 == y_ref))

    # Explicit materialized path: exercises the Pallas HBM->HBM DMA kernel.
    y1 = view_pallas(x, (-1, 4 * 16 * 16), materialize=True)
    jax.block_until_ready(y1)
    assert y1.shape == (2, 1024) and y1.dtype == x.dtype
    assert bool(jnp.all(y1 == y_ref))

    # Ragged numel (not a multiple of 128) through the DMA kernel as well;
    # no VMEM block is allocated, so arbitrary sizes are safe.
    x2 = jax.random.normal(key, (2, 3, 5), dtype=jnp.float32)
    y2 = view_pallas(x2, (-1,), materialize=True)
    jax.block_until_ready(y2)
    assert y2.shape == (30,)
    assert bool(jnp.all(y2 == x2.reshape(-1)))

    print("KERNEL_OK")
</pallas_src>

<mosaic_0001>
module attributes {stable_mosaic.version = 11 : i64} {
  func.func @_dma_copy_kernel(%arg0: i32, %arg1: memref<2x1024xf32, #tpu.memory_space<any>>, %arg2: memref<2x1024xf32, #tpu.memory_space<any>>, %arg3: memref<!tpu.dma_semaphore, #tpu.memory_space<semaphore_mem>>) attributes {dimension_semantics = [#tpu.dimension_semantics<parallel>], iteration_bounds = array<i64: 2>, scalar_prefetch = 0 : i64, scratch_operands = 1 : i64, tpu.core_type = #tpu.core_type<tc>, window_params = [{}, {}]} {
    %c0_i32 = arith.constant 0 : i32
    %0 = tpu.memref_slice %arg1[%arg0, %c0_i32] : memref<2x1024xf32, #tpu.memory_space<any>> -> memref<1x1024xf32, #tpu.memory_space<any>>
    %1 = tpu.memref_squeeze %0 : memref<1x1024xf32, #tpu.memory_space<any>> -> memref<1024xf32, #tpu.memory_space<any>>
    %c0_i32_0 = arith.constant 0 : i32
    %2 = tpu.memref_slice %arg2[%arg0, %c0_i32_0] : memref<2x1024xf32, #tpu.memory_space<any>> -> memref<1x1024xf32, #tpu.memory_space<any>>
    %3 = tpu.memref_squeeze %2 : memref<1x1024xf32, #tpu.memory_space<any>> -> memref<1024xf32, #tpu.memory_space<any>>
    tpu.enqueue_dma source(%1 : memref<1024xf32, #tpu.memory_space<any>>) target(%3 : memref<1024xf32, #tpu.memory_space<any>>) target_semaphore(%arg3 : memref<!tpu.dma_semaphore, #tpu.memory_space<semaphore_mem>>)
    %c0_i32_1 = arith.constant 0 : i32
    %4 = tpu.memref_slice %arg1[%arg0, %c0_i32_1] : memref<2x1024xf32, #tpu.memory_space<any>> -> memref<1x1024xf32, #tpu.memory_space<any>>
    %5 = tpu.memref_squeeze %4 : memref<1x1024xf32, #tpu.memory_space<any>> -> memref<1024xf32, #tpu.memory_space<any>>
    %c0_i32_2 = arith.constant 0 : i32
    %6 = tpu.memref_slice %arg2[%arg0, %c0_i32_2] : memref<2x1024xf32, #tpu.memory_space<any>> -> memref<1x1024xf32, #tpu.memory_space<any>>
    %7 = tpu.memref_squeeze %6 : memref<1x1024xf32, #tpu.memory_space<any>> -> memref<1024xf32, #tpu.memory_space<any>>
    tpu.wait_dma2 semaphore(%arg3 : memref<!tpu.dma_semaphore, #tpu.memory_space<semaphore_mem>>) src(%5 : memref<1024xf32, #tpu.memory_space<any>>) dst(%7 : memref<1024xf32, #tpu.memory_space<any>>)
    return
  }
}

</mosaic_0001>

<bundles_post_ra>
// kernel: tpu_custom_call.1
= control target key start
LH: loop header
LB: loop body
LE: loop exit
PB: predicated region body
PF: predicated region fallthrough
CT: control target
= control target key end

     0   :  { %s77_s6 = smov 0   ;;  %s102_s0 = inlined_call_operand.hbm [shape: f32[2,1024], index: 0, kind: input, shape index: {}]   ;;  %s103_s1 = inlined_call_operand.hbm [shape: f32[2,1024], index: 1, kind: output, shape index: {}]  }
   0x1 LB: > { %s13_s7 = sshrl.u32 %s79_s6, 1  ;;  %s14_s8 = sand.u32 1, %s79_s6   ;;  %s79_s6 = sphi %s77_s6, %s11_s6  }
   0x2   : > { %s56_s9 = sshll.u32 %s13_s7, 4  ;;  %s81_s11 = smov 32  }
   0x3   : > { %s16_s10 = sadd.s32 %s56_s9, %s14_s8  ;;  %30 = sst [smem:[#allocation4]] %s81_s11 }
   0x4   : > { %s17_s14 = scalar_lea.hbm %s102_s0, %s16_s10  ;;  %s18_s17 = scalar_lea.hbm %s103_s1, %s16_s10 }
   0x5   : > { %s23_s18 = sshll.u32 %s17_s14, 4  ;;  %s25_s19 = sshll.u32 %s18_s17, 4  ;;  %s24_s18 = int_to_ptr.hbm [resolvable:$true] %s23_s18  ;;  %s26_s19 = int_to_ptr.hbm [resolvable:$true] %s25_s19 }
   0x6   : > { %32 = sst [smem:[#allocation4 + $0x1]] %s81_s11  ;;  %s82_s20 = smov 1  }
   0x7   : > { %34 = sst [smem:[#allocation4 + $0x2]] %s82_s20  ;;  %s83_s21 = smov [#allocation2]  }
   0x8   : > { %s84_s22 = smov [#allocation3]   ;;  %s85_s23 = smov 0  }
   0x9   : > { %36 = dma.general %s24_s18, 128, %s26_s19, %s83_s21, %s84_s22, [#allocation4], %s85_s23, 0  }
   0xa   : > { %75 = dma.done.wait [#allocation2], 128 }
   0xb   : > { %76 = vsyncadd [#allocation2], 4294967168  ;;  %s11_s6 = sadd.s32 1, %s79_s6  }
   0xc   : > { %p8_p0 = scmp.ge.s32.totalorder %s11_s6, 2  }
   0xe   :  { %10 = sbr.rel (!%p8_p0) target bundleno = 1 (0x1), region = 23 }
  0x13   :  { %39 = vsyncmov [#allocation2] }
  0x16   :  { %s40_s24 = vpop.sfrf %39 }
  0x17   :  { %p57_p1 = scmp.ne.s32.totalorder %s40_s24, 0 }
  0x19   :  { %44 = shalt.err (%p57_p1)  }

</bundles_post_ra>
